<compile_context>
chip_gen: v7x
topology: tpu7x:2x2x1
jax: 0.10.0
libtpu: 0.0.40
codegen_flags: <defaults>
</compile_context>

<pallas_src>
import functools

import jax
import jax.numpy as jnp
from jax import lax
from jax.experimental import pallas as pl
from jax.experimental.pallas import tpu as pltpu


def _round_up(x, m):
    return ((x + m - 1) // m) * m


def _cdiv(a, b):
    return -(-a // b)


def _padded_tile_bytes(rows, cols, itemsize):
    # VMEM buffers live in (8, 128) tiles -> both trailing dims get padded.
    return _round_up(rows, 8) * _round_up(cols, 128) * itemsize


def _make_ve_kernel(r):
    """Kernel over one (tm_rows, L) output tile, L = r * H.

    x_ref   : (tm_rows, r)  f32   r consecutive tokens per output row
    w1e_ref : (r, L)        f32   kron(I_r, w1^T)  (scatter + Linear(1,H) weight)
    b1_ref  : (1, L)        f32   b1 tiled r times
    w2b_ref : (L, L)        mm    kron(I_r, W2)    (block-diagonal layer 2)
    b2_ref  : (1, L)        f32   b2 tiled r times
    o_ref   : (tm_rows, L)  out   bit-identical to row-major (tm_rows*r, H)
    """

    def kernel(x_ref, w1e_ref, b1_ref, w2b_ref, b2_ref, o_ref):
        x = x_ref[...]                                        # (tm, r) f32
        if r == 1:
            h = x * w1e_ref[...]                              # (tm,1)*(1,L) VPU
        else:
            # kron(I_r, w1) both scatters each token to its H-lane slot and
            # applies the Linear(1, H) weight in one tiny-K MXU matmul.
            h = jnp.dot(x, w1e_ref[...],
                        preferred_element_type=jnp.float32,
                        precision=lax.Precision.HIGHEST)
        h = jnp.maximum(h + b1_ref[...], 0.0)                 # bias + ReLU, f32 VPU
        w2b = w2b_ref[...]                                    # (L, L), matmul dtype
        prec = (lax.Precision.HIGHEST if w2b.dtype == jnp.float32
                else lax.Precision.DEFAULT)
        # Contract on W2's dim 1 (== h @ W2^T): no transposed copy of W2 is
        # ever materialized; the MXU consumes the transposed contraction.
        o = lax.dot_general(h.astype(w2b.dtype), w2b,
                            dimension_numbers=(((1,), (1,)), ((), ())),
                            preferred_element_type=jnp.float32,
                            precision=prec)
        o_ref[...] = (o + b2_ref[...]).astype(o_ref.dtype)

    return kernel


@functools.partial(jax.jit,
                   static_argnames=("block_tokens", "out_dtype", "matmul_dtype"))
def value_embedding(x, w1, b1, w2, b2, *, block_tokens=None,
                    out_dtype=jnp.float32, matmul_dtype=jnp.bfloat16):
    """ValueEmbedding forward: relu(x[..., None] @ w1.T + b1) @ w2.T + b2.

    x : (B, S) values; w1: (H, 1), b1: (H,), w2: (H, H), b2: (H,)  (nn.Linear).
    Returns (B, S, H) in out_dtype.

    Fast path (store-bound kernel): out_dtype=jnp.bfloat16 halves the HBM
    store stream; matmul_dtype=jnp.bfloat16 (default) keeps the MXU at full
    rate.  matmul_dtype=jnp.float32 gives the bit-accurate reference path.
    """
    B, S = x.shape
    H = w1.shape[0]
    N = B * S

    # Token packing factor: r consecutive tokens share one 128-lane output row.
    if H % 128 == 0:
        r = 1                       # already lane-dense
    elif 128 % H == 0:
        r = 128 // H                # pack to a lane-dense (rows, 128) slab
    else:
        r = 1                       # TODO(synk): irregular H -> masked stores
    L = r * H

    out_isz = jnp.dtype(out_dtype).itemsize
    mm_isz = jnp.dtype(matmul_dtype).itemsize

    # --- token-row tiling: ~2 MiB per (out + x) tile, >= 2 grid steps --------
    n_tok = _round_up(N, 8 * r)              # rows multiple of 8 (tiny pad)
    rows_total = n_tok // r
    bytes_per_row = L * out_isz + _round_up(r, 128) * 4   # out + (lane-padded) x
    if block_tokens is not None:
        tm_rows = max(8, _round_up(_cdiv(int(block_tokens), r), 8))
    else:
        tm_rows = max(8, ((2 << 20) // bytes_per_row) // 8 * 8)
    # Keep >= 2 grid steps whenever there is enough work (v7x megacore).
    tm_rows = min(tm_rows, max(8, _round_up(_cdiv(rows_total, 2), 8)))
    tm_rows = min(tm_rows, rows_total)
    grid = (_cdiv(rows_total, tm_rows),)     # ragged last block is fine

    # --- operands -------------------------------------------------------------
    x_flat = x.reshape(-1).astype(jnp.float32)
    if n_tok > N:
        x_flat = jnp.pad(x_flat, (0, n_tok - N))
    x2 = x_flat.reshape(rows_total, r)

    w1_row = w1.reshape(1, H).astype(jnp.float32)
    eye_f32 = jnp.eye(r, dtype=jnp.float32)
    w1e = jnp.kron(eye_f32, w1_row)                                   # (r, L)
    b1t = jnp.tile(b1.astype(jnp.float32), r).reshape(1, L)
    b2t = jnp.tile(b2.astype(jnp.float32), r).reshape(1, L)
    if r == 1:
        w2b = w2.astype(matmul_dtype)                                 # (H, H)
    else:
        w2b = jnp.kron(jnp.eye(r, dtype=matmul_dtype), w2.astype(matmul_dtype))

    # --- VMEM budget: Pallas double-buffers every operand (even grid-invariant
    # ones), and VMEM buffers are padded to (8, 128) tiles -> count both.
    vmem_est = (2 * _padded_tile_bytes(tm_rows, r, 4)               # x tiles
                + 2 * _padded_tile_bytes(tm_rows, L, out_isz)       # out tiles
                + 2 * (_padded_tile_bytes(r, L, 4)                  # w1e
                       + 2 * _padded_tile_bytes(1, L, 4)            # b1, b2
                       + _padded_tile_bytes(L, L, mm_isz))          # w2 block
                + (4 << 20))                                        # headroom
    try:
        cap = int(getattr(pltpu.get_tpu_info(), "vmem_capacity_bytes",
                          64 << 20)) * 3 // 4
    except Exception:  # pragma: no cover - conservative fallback
        cap = 48 << 20
    vmem_limit = int(min(max(vmem_est, 32 << 20), cap))

    out = pl.pallas_call(
        _make_ve_kernel(r),
        out_shape=jax.ShapeDtypeStruct((rows_total, L), out_dtype),
        grid_spec=pltpu.PrefetchScalarGridSpec(
            num_scalar_prefetch=0,
            grid=grid,
            in_specs=[
                pl.BlockSpec((tm_rows, r), lambda i: (i, 0)),   # x tile
                pl.BlockSpec((r, L), lambda i: (0, 0)),         # kron(I, w1)
                pl.BlockSpec((1, L), lambda i: (0, 0)),         # b1 (tiled)
                pl.BlockSpec((L, L), lambda i: (0, 0)),         # kron(I, W2)
                pl.BlockSpec((1, L), lambda i: (0, 0)),         # b2 (tiled)
            ],
            out_specs=pl.BlockSpec((tm_rows, L), lambda i: (i, 0)),
        ),
        compiler_params=pltpu.CompilerParams(
            dimension_semantics=("parallel",),
            vmem_limit_bytes=vmem_limit,
        ),
    )(x2, w1e, b1t, w2b, b2t)

    # (rows_total, L) row-major is bit-identical to (n_tok, H) row-major.
    out = out.reshape(n_tok, H)
    if n_tok > N:
        out = out[:N]
    return out.reshape(B, S, H)


def _ref_forward(x, w1, b1, w2, b2):
    h = jnp.maximum(x[..., None] * w1.reshape(-1) + b1, 0.0)
    return jnp.dot(h, w2.T, precision=lax.Precision.HIGHEST) + b2


if __name__ == "__main__":
    key = jax.random.PRNGKey(0)

    def make_params(k, H):
        k1, k2, k3, k4 = jax.random.split(k, 4)
        w1 = jax.random.uniform(k1, (H, 1), jnp.float32, -1.0, 1.0)
        b1 = jax.random.uniform(k2, (H,), jnp.float32, -1.0, 1.0)
        bound = 1.0 / (H ** 0.5)
        w2 = jax.random.uniform(k3, (H, H), jnp.float32, -bound, bound)
        b2 = jax.random.uniform(k4, (H,), jnp.float32, -bound, bound)
        return w1, b1, w2, b2

    # --- case 1: H=32 -> packed lane-dense path (r = 4 tokens per row) -------
    B, S, H = 2, 8, 32
    kx, kp, key = jax.random.split(key, 3)
    x = jax.random.normal(kx, (B, S), dtype=jnp.float32)
    w1, b1, w2, b2 = make_params(kp, H)
    ref = _ref_forward(x, w1, b1, w2, b2)

    out = jax.block_until_ready(
        value_embedding(x, w1, b1, w2, b2, matmul_dtype=jnp.float32))
    assert out.shape == (B, S, H) and out.dtype == jnp.float32
    assert jnp.allclose(out, ref, atol=1e-4, rtol=1e-4)

    out_fast = jax.block_until_ready(value_embedding(x, w1, b1, w2, b2))
    assert jnp.allclose(out_fast, ref, atol=5e-2, rtol=5e-2)

    # --- case 2: H=128 -> natural lane-dense path (r = 1) --------------------
    B2, S2, H2 = 2, 24, 128
    kx2, kp2, key = jax.random.split(key, 3)
    x2 = jax.random.normal(kx2, (B2, S2), dtype=jnp.float32)
    w1b, b1b, w2c, b2c = make_params(kp2, H2)
    ref2 = _ref_forward(x2, w1b, b1b, w2c, b2c)

    out2 = jax.block_until_ready(
        value_embedding(x2, w1b, b1b, w2c, b2c, matmul_dtype=jnp.float32))
    assert out2.shape == (B2, S2, H2)
    assert jnp.allclose(out2, ref2, atol=1e-4, rtol=1e-4)

    # Fast path: bf16 matmul operands + bf16 output (store-bound win).
    out2_fast = jax.block_until_ready(
        value_embedding(x2, w1b, b1b, w2c, b2c, out_dtype=jnp.bfloat16))
    assert out2_fast.dtype == jnp.bfloat16
    assert jnp.allclose(out2_fast.astype(jnp.float32), ref2, atol=1e-1, rtol=1e-1)

    print("KERNEL_OK")
</pallas_src>

<mosaic_0001>
module attributes {stable_mosaic.version = 11 : i64} {
  func.func @kernel(%arg0: i32, %arg1: memref<8x4xf32, #tpu.memory_space<vmem>>, %arg2: memref<4x128xf32, #tpu.memory_space<vmem>>, %arg3: memref<1x128xf32, #tpu.memory_space<vmem>>, %arg4: memref<128x128xf32, #tpu.memory_space<vmem>>, %arg5: memref<1x128xf32, #tpu.memory_space<vmem>>, %arg6: memref<8x128xf32, #tpu.memory_space<vmem>>) attributes {dimension_semantics = [#tpu.dimension_semantics<parallel>], iteration_bounds = array<i64: 1>, scalar_prefetch = 0 : i64, scratch_operands = 0 : i64, tpu.core_type = #tpu.core_type<tc>, window_params = [{transform_indices = @transform_0, window_bounds = array<i64: 8, 4>}, {pipeline_mode = #tpu.pipeline_mode<synchronous>, transform_indices = @transform_1, window_bounds = array<i64: 4, 128>}, {pipeline_mode = #tpu.pipeline_mode<synchronous>, transform_indices = @transform_2, window_bounds = array<i64: 1, 128>}, {pipeline_mode = #tpu.pipeline_mode<synchronous>, transform_indices = @transform_3, window_bounds = array<i64: 128, 128>}, {pipeline_mode = #tpu.pipeline_mode<synchronous>, transform_indices = @transform_4, window_bounds = array<i64: 1, 128>}, {transform_indices = @transform_5, window_bounds = array<i64: 8, 128>}]} {
    %c0 = arith.constant 0 : index
    %c0_0 = arith.constant 0 : index
    %0 = vector.load %arg1[%c0, %c0_0] : memref<8x4xf32, #tpu.memory_space<vmem>>, vector<8x4xf32>
    %c0_1 = arith.constant 0 : index
    %c0_2 = arith.constant 0 : index
    %1 = vector.load %arg2[%c0_1, %c0_2] : memref<4x128xf32, #tpu.memory_space<vmem>>, vector<4x128xf32>
    %cst = arith.constant dense<0.000000e+00> : vector<8x128xf32>
    %2 = tpu.matmul %0, %1, %cst {dimension_numbers = #tpu.dot_dimension_numbers<[1], [0], [0], [1], [0, 0, 1, 1], [], []>, precision = #tpu.contract_precision<fp32>} : vector<8x4xf32>, vector<4x128xf32>, vector<8x128xf32> -> vector<8x128xf32>
    %c0_3 = arith.constant 0 : index
    %c0_4 = arith.constant 0 : index
    %3 = vector.load %arg3[%c0_3, %c0_4] : memref<1x128xf32, #tpu.memory_space<vmem>>, vector<1x128xf32>
    %4 = vector.broadcast %3 : vector<1x128xf32> to vector<8x128xf32>
    %5 = arith.addf %2, %4 : vector<8x128xf32>
    %cst_5 = arith.constant 0.000000e+00 : f32
    %6 = vector.broadcast %cst_5 : f32 to vector<8x128xf32>
    %7 = arith.maximumf %5, %6 : vector<8x128xf32>
    %c0_6 = arith.constant 0 : index
    %c0_7 = arith.constant 0 : index
    %8 = vector.load %arg4[%c0_6, %c0_7] : memref<128x128xf32, #tpu.memory_space<vmem>>, vector<128x128xf32>
    %cst_8 = arith.constant dense<0.000000e+00> : vector<8x128xf32>
    %9 = tpu.matmul %7, %8, %cst_8 {dimension_numbers = #tpu.dot_dimension_numbers<[1], [1], [0], [0], [0, 0, 1, 0], [], []>, precision = #tpu.contract_precision<fp32>} : vector<8x128xf32>, vector<128x128xf32>, vector<8x128xf32> -> vector<8x128xf32>
    %c0_9 = arith.constant 0 : index
    %c0_10 = arith.constant 0 : index
    %10 = vector.load %arg5[%c0_9, %c0_10] : memref<1x128xf32, #tpu.memory_space<vmem>>, vector<1x128xf32>
    %11 = vector.broadcast %10 : vector<1x128xf32> to vector<8x128xf32>
    %12 = arith.addf %9, %11 : vector<8x128xf32>
    %c0_11 = arith.constant 0 : index
    %c0_12 = arith.constant 0 : index
    %13 = vector.load %arg6[%c0_11, %c0_12] : memref<8x128xf32, #tpu.memory_space<vmem>>, vector<8x128xf32>
    tpu.vector_store %arg6[%c0_11, %c0_12], %12 {strides = array<i32>} : memref<8x128xf32, #tpu.memory_space<vmem>>, vector<8x128xf32>,
    return
  }
  func.func @transform_0(%arg0: i32) -> (i32, i32) {
    %c0_i32 = arith.constant 0 : i32
    %c0_i32_0 = arith.constant 0 : i32
    return %arg0, %c0_i32 : i32, i32
  }
  func.func @transform_1(%arg0: i32) -> (i32, i32) {
    %c0_i32 = arith.constant 0 : i32
    %c0_i32_0 = arith.constant 0 : i32
    %c0_i32_1 = arith.constant 0 : i32
    return %c0_i32, %c0_i32_0 : i32, i32
  }
  func.func @transform_2(%arg0: i32) -> (i32, i32) {
    %c0_i32 = arith.constant 0 : i32
    %c0_i32_0 = arith.constant 0 : i32
    %c0_i32_1 = arith.constant 0 : i32
    return %c0_i32, %c0_i32_0 : i32, i32
  }
  func.func @transform_3(%arg0: i32) -> (i32, i32) {
    %c0_i32 = arith.constant 0 : i32
    %c0_i32_0 = arith.constant 0 : i32
    %c0_i32_1 = arith.constant 0 : i32
    return %c0_i32, %c0_i32_0 : i32, i32
  }
  func.func @transform_4(%arg0: i32) -> (i32, i32) {
    %c0_i32 = arith.constant 0 : i32
    %c0_i32_0 = arith.constant 0 : i32
    %c0_i32_1 = arith.constant 0 : i32
    return %c0_i32, %c0_i32_0 : i32, i32
  }
  func.func @transform_5(%arg0: i32) -> (i32, i32) {
    %c0_i32 = arith.constant 0 : i32
    %c0_i32_0 = arith.constant 0 : i32
    return %arg0, %c0_i32 : i32, i32
  }
}

</mosaic_0001>

<bundles_post_ra>
// kernel: tile.14
= control target key start
LH: loop header
LB: loop body
LE: loop exit
PB: predicated region body
PF: predicated region fallthrough
CT: control target
= control target key end

     0   :  { %vm7_vm0 = vcmask 261120   ;;  %s37_s8 = smov 32   ;;  %s38_s9 = smov 64   ;;  %vm13_vm1 = vcmask 1048320   ;;  %vm19_vm2 = vcmask 785920   ;;  %vm25_vm3 = vcmask 523520   ;;  %s55_s0 = inlined_call_operand.vmem [shape: f32[4,32], index: 0, kind: input, shape index: {}]   ;;  %s56_s1 = inlined_call_operand.vmem [shape: f32[1,128], index: 1, kind: output, shape index: {}]  }
   0x1   :  { %v4_v0 = vld [vmem:[%s55_s0] sm:$0xf]  ;;  %s36_s0 = smov 96  }
   0x2   :  { %5 = vst [vmem:[#allocation1] sm:$0xf] %v4_v0 }
   0x9   :  { %v10_v1 = vld [vmem:[#allocation1 + $0x3] sm:$0x1]   ;;  %v22_v2 = vld [vmem:[#allocation1 + $0x1] sm:$0x1]   ;;  %v6_v3 = vld [vmem:[#allocation1] sm:$0x1]  }
   0xa   :  { %11 = vrot.lane.b32.xlu0 %v10_v1, %s36_s0  ;;  %23 = vrot.lane.b32.xlu1 %v22_v2, %s37_s8  ;;  %v16_v4 = vld [vmem:[#allocation1 + $0x2] sm:$0x1]   ;;  %8 = vst.msk [vmem:[#allocation0] sm:$0x1] %vm7_vm0, %v6_v3  }
   0xe   :  { %17 = vrot.lane.b32.xlu0 %v16_v4, %s38_s9 }
  0x7c   :  { %v12_v5 = vpop.permute.xlu0 %11   ;;  %v24_v6 = vpop.permute.xlu1 %23  }
  0x7d   :  { %14 = vst.msk [vmem:[#allocation0] sm:$0x1] %vm13_vm1, %v12_v5  }
  0x80   :  { %v18_v7 = vpop.permute.xlu0 %17  }
  0x81   :  { %20 = vst.msk [vmem:[#allocation0] sm:$0x1] %vm19_vm2, %v18_v7  }
  0x82   :  { %26 = vst.msk [vmem:[#allocation0] sm:$0x1] %vm25_vm3, %v24_v6  }
  0x89   :  { %v30_v8 = vld [vmem:[#allocation0] sm:$0x1] }
  0x8a   :  { %32 = vst [vmem:[%s56_s1] sm:$0x1] %v30_v8 }

// kernel: value_embedding.1
= control target key start
LH: loop header
LB: loop body
LE: loop exit
PB: predicated region body
PF: predicated region fallthrough
CT: control target
= control target key end

     0   :  { %vm33_vm0 = vcmask 1043456   ;;  %vm29_vm1 = vcmask 31744   ;;  %v1676_v0 = vmov 0.0   ;;  %vm1677_vm2 = vmmov 0   ;;  %s2029_s1 = inlined_call_operand.vmem [shape: f32[4,128], index: 1, kind: input, shape index: {}]   ;;  %s2030_s0 = inlined_call_operand.vmem [shape: f32[8,4], index: 0, kind: input, shape index: {}]   ;;  %s2031_s3 = inlined_call_operand.vmem [shape: f32[128,128], index: 3, kind: input, shape index: {}]   ;;  %s2032_s2 = inlined_call_operand.vmem [shape: f32[1,128], index: 2, kind: input, shape index: {}]   ;;  %s2033_s4 = inlined_call_operand.vmem [shape: f32[1,128], index: 4, kind: input, shape index: {}]   ;;  %s2034_s5 = inlined_call_operand.vmem [shape: f32[8,128], index: 5, kind: output, shape index: {}]  }
   0x1   :  { %1284 = vmatprep.subr.mxu0 %v1676_v0  ;;  %v21_v1 = vld [vmem:[%s2029_s1] sm:$0xf]  ;;  %1286 = vmatprep.mubr.msk.f32.mxu0 %vm1677_vm2, %v1676_v0  ;;  %v1729_v6 = vld [vmem:[%s2031_s3 + $0x8] sm:$0xff]  ;;  %v1735_v8 = vld [vmem:[%s2031_s3 + $0x10] sm:$0xff]  ;;  %v1678_v51 = vmov 0.0|0.0  }
   0x2   :  { %v20_v2 = vld [vmem:[%s2030_s0] sm:$0xff]  ;;  %v35_v4 = vsel %vm33_vm0, %v21_v1, 0  ;;  %1269 = vmatprep.subr.mxu1 %v1676_v0  ;;  %1271 = vmatprep.mubr.msk.f32.mxu1 %vm1677_vm2, %v1676_v0  ;;  %v1740_v9 = vld [vmem:[%s2031_s3 + $0x18] sm:$0xff]  ;;  %v1750_v13 = vld [vmem:[%s2031_s3 + $0x28] sm:$0xff]  ;;  %v511_v14 = vand.u32 4294901760, %v1729_v6  ;;  %v514_v16 = vand.u32 4294901760, %v1735_v8 }
   0x3   :  { %v1721_v3 = vld [vmem:[%s2031_s3] sm:$0xff]  ;;  %v31_v5 = vsel %vm29_vm1, %v20_v2, 0  ;;  %v38_v10 = vand.u32 4294901760, %v35_v4  ;;  %v1762_v17 = vld [vmem:[%s2031_s3 + $0x30] sm:$0xff]  ;;  %v1767_v18 = vld [vmem:[%s2031_s3 + $0x38] sm:$0xff]  ;;  %v517_v21 = vand.u32 4294901760, %v1740_v9 }
   0x4   :  { %v508_v7 = vand.u32 4294901760, %v1721_v3  ;;  %v103_v11 = vand.u32 4294901760, %v31_v5  ;;  %v1745_v12 = vld [vmem:[%s2031_s3 + $0x20] sm:$0xff]  ;;  %v1774_v23 = vsub.f32 %v1729_v6, %v511_v14  ;;  %v1779_v24 = vsub.f32 %v1735_v8, %v514_v16  ;;  %v493_v32 = vld [vmem:[%s2031_s3 + $0x48] sm:$0xff]  ;;  %v1798_v33 = vld [vmem:[%s2031_s3 + $0x50] sm:$0xff] }
   0x5   :  { %v115_v19 = vsub.f32 %v35_v4, %v38_v10  ;;  %1285 = vmatpush3.msra.mxu0 %v38_v10  ;;  %1270 = vmatpush3.msra.mxu1 %v38_v10  ;;  %v520_v22 = vand.u32 4294901760, %v1745_v12  ;;  %v523_v25 = vand.u32 4294901760, %v1750_v13  ;;  %v526_v26 = vand.u32 4294901760, %v1762_v17  ;;  %v1786_v27 = vld [vmem:[%s2031_s3 + $0x40] sm:$0xff]  ;;  %v495_v37 = vld [vmem:[%s2031_s3 + $0x58] sm:$0xff]  ;;  %v497_v59 = vld [vmem:[%s2031_s3 + $0x68] sm:$0xff] }
   0x6   :  { %v1756_v15 = vsub.f32 %v1721_v3, %v508_v7  ;;  %v104_v20 = vsub.f32 %v31_v5, %v103_v11  ;;  %1274 = vmatprep.subr.mxu1 %v1676_v0  ;;  %1289 = vmatprep.subr.mxu0 %v1676_v0  ;;  %v1789_v30 = vsub.f32 %v1740_v9, %v517_v21  ;;  %v529_v31 = vand.u32 4294901760, %v1767_v18  ;;  %v496_v58 = vld [vmem:[%s2031_s3 + $0x60] sm:$0xff]  ;;  %v498_v2 = vld [vmem:[%s2031_s3 + $0x70] sm:$0xff]  ;;  %v499_v3 = vld [vmem:[%s2031_s3 + $0x78] sm:$0xff] }
   0x7   :  { %v116_v29 = vand.u32 4294901760, %v115_v19  ;;  %v1801_v34 = vsub.f32 %v1745_v12, %v520_v22  ;;  %v1804_v35 = vsub.f32 %v1750_v13, %v523_v25  ;;  %v1807_v36 = vsub.f32 %v1762_v17, %v526_v26 }
   0x8   :  { %v105_v28 = vand.u32 4294901760, %v104_v20  ;;  %v1813_v40 = vsub.f32 %v1767_v18, %v529_v31  ;;  %v532_v41 = vand.u32 4294901760, %v1786_v27  ;;  %v535_v42 = vand.u32 4294901760, %v493_v32 }
   0x9   :  { %v117_v39 = vsub.f32 %v115_v19, %v116_v29  ;;  %v538_v43 = vand.u32 4294901760, %v1798_v33  ;;  %v541_v47 = vand.u32 4294901760, %v495_v37  ;;  %v1841_v52 = vpack.c.bf16 %v511_v14, %v508_v7 }
   0xa   :  { %1287 = vmatmul.mubr.f32.vlgmr.msra.gmra.mrb[0].mxu0 %v105_v28  ;;  %v106_v38 = vsub.f32 %v104_v20, %v105_v28  ;;  %v1821_v46 = vsub.f32 %v1786_v27, %v532_v41  ;;  %v1823_v48 = vsub.f32 %v493_v32, %v535_v42  ;;  %v1853_v53 = vpack.c.bf16 %v517_v21, %v514_v16 }
   0xb   :  { %1290 = vmatpush3.msra.mxu0 %v116_v29  ;;  %1291 = vmatprep.mubr.msk.f32.mxu0 %vm1677_vm2, %v1676_v0  ;;  %v118_v45 = vand.u32 4294901760, %v117_v39  ;;  %v1826_v49 = vsub.f32 %v1798_v33, %v538_v43  ;;  %v1828_v50 = vsub.f32 %v495_v37, %v541_v47  ;;  %v1859_v54 = vpack.c.bf16 %v523_v25, %v520_v22 }
   0xc   :  { %v107_v44 = vand.u32 4294901760, %v106_v38  ;;  %1294 = vmatprep.subr.mxu0 %v1676_v0  ;;  %v1865_v55 = vpack.c.bf16 %v529_v31, %v526_v26  ;;  %v1871_v56 = vpack.c.bf16 %v535_v42, %v532_v41  ;;  %v1877_v57 = vpack.c.bf16 %v541_v47, %v538_v43 }
   0xd   :  { %v544_v60 = vand.u32 4294901760, %v496_v58  ;;  %v547_v61 = vand.u32 4294901760, %v497_v59  ;;  %v550_v4 = vand.u32 4294901760, %v498_v2  ;;  %v553_v5 = vand.u32 4294901760, %v499_v3 }
   0xe   :  { %1272 = vmatmul.mubr.f32.vlgmr.msra.gmra.mrb[0].mxu1 %v107_v44  ;;  %v601_v16 = vand.u32 4294901760, %v1756_v15  ;;  %v608_v17 = vand.u32 4294901760, %v1774_v23  ;;  %v615_v29 = vand.u32 4294901760, %v1779_v24  ;;  %v622_v31 = vand.u32 4294901760, %v1789_v30 }
   0xf   :  { %1275 = vmatpush3.msra.mxu1 %v118_v45  ;;  %1276 = vmatprep.mubr.msk.f32.mxu1 %vm1677_vm2, %v1676_v0  ;;  %v1889_v62 = vpack.c.bf16 %v547_v61, %v544_v60  ;;  %v1891_v63 = vsub.f32 %v496_v58, %v544_v60  ;;  %v1893_v1 = vsub.f32 %v497_v59, %v547_v61  ;;  %v629_v45 = vand.u32 4294901760, %v1801_v34 }
  0x10   :  { %1279 = vmatprep.subr.mxu1 %v1676_v0  ;;  %v1905_v6 = vpack.c.bf16 %v553_v5, %v550_v4  ;;  %v1911_v7 = vsub.f32 %v498_v2, %v550_v4  ;;  %v1913_v8 = vsub.f32 %v499_v3, %v553_v5  ;;  %v609_v21 = vsub.f32 %v1774_v23, %v608_v17 }
  0x11   :  { %v1606_v26 = vpack.c.bf16 %v608_v17, %v601_v16  ;;  %v616_v38 = vsub.f32 %v1779_v24, %v615_v29  ;;  %v623_v39 = vsub.f32 %v1789_v30, %v622_v31  ;;  %v1609_v42 = vpack.c.bf16 %v622_v31, %v615_v29 }
  0x12   :  { %1292 = vmatmul.mubr.f32.vlgmr.msra.gmra.mrb[0].mxu0 %v103_v11  ;;  %v610_v28 = vand.u32 4294901760, %v609_v21  ;;  %v636_v47 = vand.u32 4294901760, %v1804_v35  ;;  %v630_v59 = vsub.f32 %v1801_v34, %v629_v45  ;;  %v643_v4 = vand.u32 4294901760, %v1807_v36 }
  0x13   :  { %1295 = vmatpush3.msra.mxu0 %v38_v10  ;;  %1296 = vmatprep.mubr.msk.f32.mxu0 %vm1677_vm2, %v1676_v0  ;;  %v617_v43 = vand.u32 4294901760, %v616_v38  ;;  %v624_v44 = vand.u32 4294901760, %v623_v39  ;;  %v650_v5 = vand.u32 4294901760, %v1813_v40  ;;  %v664_v17 = vand.u32 4294901760, %v1823_v48 }
  0x14   :  { %1509 = vmatprep.subr.bf16.mxu0 %v1678_v51  ;;  %v637_v60 = vsub.f32 %v1804_v35, %v636_v47  ;;  %v1612_v61 = vpack.c.bf16 %v636_v47, %v629_v45  ;;  %v631_v2 = vand.u32 4294901760, %v630_v59  ;;  %v678_v29 = vand.u32 4294901760, %v1828_v50 }
  0x15   :  { %v1537_v58 = vpack.c.bf16 %v624_v44, %v617_v43 }
  0x16   :  { %1277 = vmatmul.mubr.f32.vlgmr.msra.gmra.mrb[0].mxu1 %v103_v11  ;;  %v638_v3 = vand.u32 4294901760, %v637_v60  ;;  %v699_v60 = vand.u32 4294901760, %v1911_v7 }
  0x17   :  { %1280 = vmatpush3.msra.mxu1 %v115_v19  ;;  %1281 = vmatprep.mubr.msk.f32.mxu1 %vm1677_vm2, %v1676_v0 }
  0x18   :  { %1581 = vmatprep.subr.bf16.mxu1 %v1678_v51 }
  0x1a   :  { %1297 = vmatmul.mubr.f32.vlgmr.msra.gmra.mrb[0].mxu0 %v103_v11  ;;  %v1153_v11 = vld [vmem:[%s2032_s2] ss:$0 sm:$0xff] }
  0x1b   :  { %1511 = vmatpush3.bf16.xpose.msra.mxu0 %v1841_v52  ;;  %1331 = vmatprep.mubr.msk.f32.mxu0 %vm1677_vm2, %v1676_v0 }
  0x1c   :  { %1512 = vmatprep.subr.bf16.mxu0 %v1678_v51 }
  0x1e   :  { %1282 = vmatmul.mubr.f32.vlgmr.msra.gmra.mrb[0].mxu1 %v104_v20  ;;  %v602_v20 = vsub.f32 %v1756_v15, %v601_v16  ;;  %v657_v16 = vand.u32 4294901760, %v1821_v46 }
  0x1f   :  { %1583 = vmatpush3.bf16.xpose.msra.mxu1 %v1841_v52  ;;  %1436 = vmatprep.mubr.msk.f32.mxu1 %vm1677_vm2, %v1676_v0 }
  0x20   :  { %1584 = vmatprep.subr.bf16.mxu1 %v1678_v51  ;;  %v603_v27 = vand.u32 4294901760, %v602_v20  ;;  %v665_v20 = vsub.f32 %v1823_v48, %v664_v17  ;;  %v1618_v21 = vpack.c.bf16 %v664_v17, %v657_v16 }
  0x22   :  { %v1534_v37 = vpack.c.bf16 %v610_v28, %v603_v27  ;;  %v666_v27 = vand.u32 4294901760, %v665_v20  ;;  %v671_v28 = vand.u32 4294901760, %v1826_v49 }
  0x23   :  { %1514 = vmatpush3.bf16.xpose.msra.mxu0 %v1853_v53 }
  0x24   :  { %1515 = vmatprep.subr.bf16.mxu0 %v1678_v51 }
  0x27   :  { %1586 = vmatpush3.bf16.xpose.msra.mxu1 %v1853_v53 }
  0x28   :  { %1587 = vmatprep.subr.bf16.mxu1 %v1678_v51 }
  0x2b   :  { %1517 = vmatpush3.bf16.xpose.msra.mxu0 %v1859_v54 }
  0x2c   :  { %1518 = vmatprep.subr.bf16.mxu0 %v1678_v51 }
  0x2f   :  { %1589 = vmatpush3.bf16.xpose.msra.mxu1 %v1859_v54 }
  0x30   :  { %1590 = vmatprep.subr.bf16.mxu1 %v1678_v51 }
  0x33   :  { %1520 = vmatpush3.bf16.xpose.msra.mxu0 %v1865_v55 }
  0x34   :  { %1521 = vmatprep.subr.bf16.mxu0 %v1678_v51 }
  0x37   :  { %1592 = vmatpush3.bf16.xpose.msra.mxu1 %v1865_v55 }
  0x38   :  { %1593 = vmatprep.subr.bf16.mxu1 %v1678_v51 }
  0x3b   :  { %1523 = vmatpush3.bf16.xpose.msra.mxu0 %v1871_v56 }
  0x3c   :  { %1524 = vmatprep.subr.bf16.mxu0 %v1678_v51 }
  0x3f   :  { %1595 = vmatpush3.bf16.xpose.msra.mxu1 %v1871_v56 }
  0x40   :  { %1596 = vmatprep.subr.bf16.mxu1 %v1678_v51 }
  0x43   :  { %1526 = vmatpush3.bf16.xpose.msra.mxu0 %v1877_v57 }
  0x44   :  { %1527 = vmatprep.subr.bf16.mxu0 %v1678_v51 }
  0x47   :  { %1598 = vmatpush3.bf16.xpose.msra.mxu1 %v1877_v57 }
  0x48   :  { %1599 = vmatprep.subr.bf16.mxu1 %v1678_v51 }
  0x4b   :  { %1529 = vmatpush3.bf16.xpose.msra.mxu0 %v1889_v62 }
  0x4c   :  { %1530 = vmatprep.subr.bf16.mxu0 %v1678_v51 }
  0x4f   :  { %1601 = vmatpush3.bf16.xpose.msra.mxu1 %v1889_v62 }
  0x50   :  { %1602 = vmatprep.subr.bf16.mxu1 %v1678_v51 }
  0x53   :  { %1532 = vmatpush3.bf16.xpose.msra.mxu0 %v1905_v6 }
  0x54   :  { %1533 = vmatprep.subr.bf16.mxu0 %v1678_v51 }
  0x57   :  { %1604 = vmatpush3.bf16.xpose.msra.mxu1 %v1905_v6 }
  0x58   :  { %1605 = vmatprep.subr.bf16.mxu1 %v1678_v51 }
  0xed   :  { %v479_v9 = vpop.f32.mrb[0].mxu0 }
  0xee   :  { %v1298_v10 = vpop.f32.mrb[1].mxu0 }
  0xef   :  { %v644_v10 = vsub.f32 %v1807_v36, %v643_v4 }
  0xf1   :  { %v259_v12 = vpop.f32.mrb[0].mxu1 }
  0xf2   :  { %v1653_v13 = vadd.f32 %v1153_v11, %v259_v12  ;;  %v1283_v14 = vpop.f32.mrb[1].mxu1  ;;  %v651_v11 = vsub.f32 %v1813_v40, %v650_v5  ;;  %v1615_v12 = vpack.c.bf16 %v650_v5, %v643_v4 }
  0xf4   :  { %v1654_v18 = vadd.f32 %v1653_v13, %v479_v9  ;;  %v1540_v9 = vpack.c.bf16 %v638_v3, %v631_v2  ;;  %v645_v13 = vand.u32 4294901760, %v644_v10  ;;  %v652_v14 = vand.u32 4294901760, %v651_v11 }
  0xf5   :  { %v700_v3 = vsub.f32 %v1911_v7, %v699_v60 }
  0xf6   :  { %v483_v19 = vmax.f32 %v1654_v18, 0.0  ;;  %v1543_v18 = vpack.c.bf16 %v652_v14, %v645_v13 }
  0xf8   :  { %v1922_v22 = vand.u32 4294901760, %v483_v19 }
  0xfa   :  { %v1925_v25 = vsub.f32 %v483_v19, %v1922_v22  ;;  %v658_v19 = vsub.f32 %v1821_v46, %v657_v16 }
  0xfc   :  { %v590_v32 = vand.u32 4294901760, %v1925_v25 }
  0xfe   :  { %1437 = vmatmul.mubr.f32.vlgmr.msra.gmra.mrb[2].mxu1 %v590_v32  ;;  %v591_v33 = vsub.f32 %v1925_v25, %v590_v32  ;;  %v672_v32 = vsub.f32 %v1826_v49, %v671_v28 }
  0xff   :  { %1607 = vmatpush3.bf16.xpose.msra.mxu1 %v1606_v26  ;;  %1471 = vmatprep.mubr.msk.f32.mxu1 %vm1677_vm2, %v1676_v0  ;;  %v659_v26 = vand.u32 4294901760, %v658_v19 }
 0x100   :  { %v592_v41 = vand.u32 4294901760, %v591_v33  ;;  %1608 = vmatprep.subr.bf16.mxu1 %v1678_v51  ;;  %v679_v33 = vsub.f32 %v1828_v50, %v678_v29  ;;  %v673_v38 = vand.u32 4294901760, %v672_v32 }
 0x101   :  { %v1546_v31 = vpack.c.bf16 %v666_v27, %v659_v26 }
 0x102   :  { %1332 = vmatmul.mubr.f32.vlgmr.msra.gmra.mrb[2].mxu0 %v592_v41  ;;  %v680_v39 = vand.u32 4294901760, %v679_v33  ;;  %v685_v41 = vand.u32 4294901760, %v1891_v63 }
 0x103   :  { %1535 = vmatpush3.bf16.xpose.msra.mxu0 %v1534_v37  ;;  %1366 = vmatprep.mubr.msk.f32.mxu0 %vm1677_vm2, %v1676_v0  ;;  %v1621_v37 = vpack.c.bf16 %v678_v29, %v671_v28 }
 0x104   :  { %1536 = vmatprep.subr.bf16.mxu0 %v1678_v51  ;;  %v1549_v43 = vpack.c.bf16 %v680_v39, %v673_v38  ;;  %v686_v44 = vsub.f32 %v1891_v63, %v685_v41 }
 0x107   :  { %1610 = vmatpush3.bf16.xpose.msra.mxu1 %v1609_v42  ;;  %v692_v42 = vand.u32 4294901760, %v1893_v1 }
 0x108   :  { %1611 = vmatprep.subr.bf16.mxu1 %v1678_v51 }
 0x109   :  { %v693_v45 = vsub.f32 %v1893_v1, %v692_v42  ;;  %v1624_v47 = vpack.c.bf16 %v692_v42, %v685_v41 }
 0x10b   :  { %1538 = vmatpush3.bf16.xpose.msra.mxu0 %v1537_v58  ;;  %v687_v58 = vand.u32 4294901760, %v686_v44  ;;  %v694_v59 = vand.u32 4294901760, %v693_v45 }
 0x10c   :  { %1539 = vmatprep.subr.bf16.mxu0 %v1678_v51 }
 0x10d   :  { %v1552_v2 = vpack.c.bf16 %v694_v59, %v687_v58 }
 0x10f   :  { %1613 = vmatpush3.bf16.xpose.msra.mxu1 %v1612_v61  ;;  %v706_v61 = vand.u32 4294901760, %v1913_v8 }
 0x110   :  { %1614 = vmatprep.subr.bf16.mxu1 %v1678_v51 }
 0x111   :  { %v707_v4 = vsub.f32 %v1913_v8, %v706_v61  ;;  %v1627_v5 = vpack.c.bf16 %v706_v61, %v699_v60 }
 0x113   :  { %1541 = vmatpush3.bf16.xpose.msra.mxu0 %v1540_v9  ;;  %v701_v9 = vand.u32 4294901760, %v700_v3  ;;  %v708_v10 = vand.u32 4294901760, %v707_v4 }
 0x114   :  { %1542 = vmatprep.subr.bf16.mxu0 %v1678_v51 }
 0x115   :  { %v1555_v11 = vpack.c.bf16 %v708_v10, %v701_v9 }
 0x117   :  { %1616 = vmatpush3.bf16.xpose.msra.mxu1 %v1615_v12  ;;  %v1558_v12 = vpack.c.bf16 %v1774_v23, %v1756_v15  ;;  %v1564_v15 = vpack.c.bf16 %v1804_v35, %v1801_v34  ;;  %v1570_v23 = vpack.c.bf16 %v1823_v48, %v1821_v46  ;;  %v1579_v34 = vpack.c.bf16 %v1913_v8, %v1911_v7 }
 0x118   :  { %1617 = vmatprep.subr.bf16.mxu1 %v1678_v51 }
 0x11b   :  { %1544 = vmatpush3.bf16.xpose.msra.mxu0 %v1543_v18 }
 0x11c   :  { %1545 = vmatprep.subr.bf16.mxu0 %v1678_v51 }
 0x11f   :  { %1619 = vmatpush3.bf16.xpose.msra.mxu1 %v1618_v21 }
 0x120   :  { %1620 = vmatprep.subr.bf16.mxu1 %v1678_v51 }
 0x123   :  { %1547 = vmatpush3.bf16.xpose.msra.mxu0 %v1546_v31 }
 0x124   :  { %1548 = vmatprep.subr.bf16.mxu0 %v1678_v51 }
 0x127   :  { %1622 = vmatpush3.bf16.xpose.msra.mxu1 %v1621_v37 }
 0x128   :  { %1623 = vmatprep.subr.bf16.mxu1 %v1678_v51 }
 0x12b   :  { %1550 = vmatpush3.bf16.xpose.msra.mxu0 %v1549_v43 }
 0x12c   :  { %1551 = vmatprep.subr.bf16.mxu0 %v1678_v51 }
 0x12f   :  { %1625 = vmatpush3.bf16.xpose.msra.mxu1 %v1624_v47 }
 0x130   :  { %1626 = vmatprep.subr.bf16.mxu1 %v1678_v51 }
 0x133   :  { %1553 = vmatpush3.bf16.xpose.msra.mxu0 %v1552_v2 }
 0x134   :  { %1554 = vmatprep.subr.bf16.mxu0 %v1678_v51 }
 0x137   :  { %1628 = vmatpush3.bf16.xpose.msra.mxu1 %v1627_v5 }
 0x138   :  { %1629 = vmatprep.subr.bf16.mxu1 %v1678_v51 }
 0x13b   :  { %1556 = vmatpush3.bf16.xpose.msra.mxu0 %v1555_v11 }
 0x13c   :  { %1557 = vmatprep.subr.bf16.mxu0 %v1678_v51 }
 0x13e   :  { %1472 = vmatmul.mubr.f32.vlgmr.msra.gmra.mrb[2].mxu1 %v1922_v22 }
 0x13f   :  { %1631 = vmatpush3.bf16.xpose.msra.mxu1 %v1841_v52  ;;  %1506 = vmatprep.mubr.msk.f32.mxu1 %vm1677_vm2, %v1676_v0  ;;  %v1561_v52 = vpack.c.bf16 %v1789_v30, %v1779_v24  ;;  %v1573_v24 = vpack.c.bf16 %v1828_v50, %v1826_v49  ;;  %v1576_v30 = vpack.c.bf16 %v1893_v1, %v1891_v63 }
 0x140   :  { %1632 = vmatprep.subr.bf16.mxu1 %v1678_v51 }
 0x142   :  { %1367 = vmatmul.mubr.f32.vlgmr.msra.gmra.mrb[2].mxu0 %v1922_v22 }
 0x143   :  { %1559 = vmatpush3.bf16.xpose.msra.mxu0 %v1558_v12  ;;  %1401 = vmatprep.mubr.msk.f32.mxu0 %vm1677_vm2, %v1676_v0  ;;  %v1567_v0 = vpack.c.bf16 %v1813_v40, %v1807_v36  ;;  %v1154_v40 = vld [vmem:[%s2033_s4] ss:$0 sm:$0xff] }
 0x144   :  { %1560 = vmatprep.subr.bf16.mxu0 %v1678_v51 }
 0x147   :  { %1634 = vmatpush3.bf16.xpose.msra.mxu1 %v1853_v53 }
 0x148   :  { %1635 = vmatprep.subr.bf16.mxu1 %v1678_v51 }
 0x14b   :  { %1562 = vmatpush3.bf16.xpose.msra.mxu0 %v1561_v52 }
 0x14c   :  { %1563 = vmatprep.subr.bf16.mxu0 %v1678_v51 }
 0x14f   :  { %1637 = vmatpush3.bf16.xpose.msra.mxu1 %v1859_v54 }
 0x150   :  { %1638 = vmatprep.subr.bf16.mxu1 %v1678_v51 }
 0x153   :  { %1565 = vmatpush3.bf16.xpose.msra.mxu0 %v1564_v15 }
 0x154   :  { %1566 = vmatprep.subr.bf16.mxu0 %v1678_v51 }
 0x157   :  { %1640 = vmatpush3.bf16.xpose.msra.mxu1 %v1865_v55 }
 0x158   :  { %1641 = vmatprep.subr.bf16.mxu1 %v1678_v51 }
 0x15b   :  { %1568 = vmatpush3.bf16.xpose.msra.mxu0 %v1567_v0 }
 0x15c   :  { %1569 = vmatprep.subr.bf16.mxu0 %v1678_v51 }
 0x15f   :  { %1643 = vmatpush3.bf16.xpose.msra.mxu1 %v1871_v56 }
 0x160   :  { %1644 = vmatprep.subr.bf16.mxu1 %v1678_v51 }
 0x163   :  { %1571 = vmatpush3.bf16.xpose.msra.mxu0 %v1570_v23 }
 0x164   :  { %1572 = vmatprep.subr.bf16.mxu0 %v1678_v51 }
 0x167   :  { %1646 = vmatpush3.bf16.xpose.msra.mxu1 %v1877_v57 }
 0x168   :  { %1647 = vmatprep.subr.bf16.mxu1 %v1678_v51 }
 0x16b   :  { %1574 = vmatpush3.bf16.xpose.msra.mxu0 %v1573_v24 }
 0x16c   :  { %1575 = vmatprep.subr.bf16.mxu0 %v1678_v51 }
 0x16f   :  { %1649 = vmatpush3.bf16.xpose.msra.mxu1 %v1889_v62 }
 0x170   :  { %1650 = vmatprep.subr.bf16.mxu1 %v1678_v51 }
 0x173   :  { %1577 = vmatpush3.bf16.xpose.msra.mxu0 %v1576_v30 }
 0x174   :  { %1578 = vmatprep.subr.bf16.mxu0 %v1678_v51 }
 0x177   :  { %1652 = vmatpush3.bf16.xpose.msra.mxu1 %v1905_v6 }
 0x17b   :  { %1580 = vmatpush3.bf16.xpose.msra.mxu0 %v1579_v34 }
 0x17e   :  { %1507 = vmatmul.mubr.f32.vlgmr.msra.gmra.mrb[2].mxu1 %v1922_v22 }
 0x182   :  { %1402 = vmatmul.mubr.f32.vlgmr.msra.gmra.mrb[2].mxu0 %v1925_v25 }
 0x251   :  { %v1144_v35 = vpop.f32.mrb[2].mxu1 }
 0x252   :  { %v1508_v36 = vpop.f32.mrb[3].mxu1 }
 0x255   :  { %v849_v46 = vpop.f32.mrb[2].mxu0 }
 0x256   :  { %v1655_v48 = vadd.f32 %v1154_v40, %v849_v46  ;;  %v1403_v49 = vpop.f32.mrb[3].mxu0 }
 0x258   :  { %v1656_v50 = vadd.f32 %v1655_v48, %v1144_v35 }
 0x25a   :  { %1148 = vst [vmem:[%s2034_s5] sm:$0xff] %v1656_v50 }

</bundles_post_ra>
